<compile_context>
chip_gen: v7x
topology: tpu7x:2x2x1
jax: 0.10.0
libtpu: 0.0.40
codegen_flags: <defaults>
</compile_context>

<pallas_src>
import functools

import jax
import jax.numpy as jnp
from jax.experimental import pallas as pl
from jax.experimental.pallas import tpu as pltpu


def _se_kernel(x_ref, w1t_ref, w2t_ref, o_ref, acc_ref, *,
               seq_len, tile_l, fold_w):
    # x_ref   : (TB, C, TILE_L)   current L tile of the input
    # w1t_ref : (C, H)            VMEM-resident (constant index_map)
    # w2t_ref : (H, C)            VMEM-resident (constant index_map)
    # o_ref   : (TB, C)           gate, written on the last L step only
    # acc_ref : (TB, C, FOLD_W)   f32 lane-aligned partial-sum accumulator
    l = pl.program_id(1)
    nl = pl.num_programs(1)

    @pl.when(l == 0)
    def _init():
        acc_ref[...] = jnp.zeros_like(acc_ref)

    xs = x_ref[...].astype(jnp.float32)                       # (TB, C, TILE_L)

    # Mask the out-of-bounds lanes of the tail block (static decision).
    if seq_len % tile_l != 0:
        rem = seq_len - l * tile_l
        lane = jax.lax.broadcasted_iota(jnp.int32, xs.shape, 2)
        xs = jnp.where(lane < rem, xs, 0.0)

    # Fold TILE_L lanes into FOLD_W lanes with pure vadds (no XLU in hot loop).
    partial = xs[..., 0:fold_w]
    for k in range(1, tile_l // fold_w):
        partial = partial + xs[..., k * fold_w:(k + 1) * fold_w]
    acc_ref[...] += partial

    @pl.when(l == nl - 1)
    def _finalize():
        # AdaptiveAvgPool1d(1): single cross-lane reduce + one scale by 1/L.
        y = jnp.sum(acc_ref[...], axis=-1) * (1.0 / seq_len)  # (TB, C) f32
        # fc[0]: Linear(C -> H, bias=False) + ReLU
        h = jnp.dot(y, w1t_ref[...], preferred_element_type=jnp.float32)
        h = jnp.maximum(h, 0.0)
        # fc[2]: Linear(H -> C, bias=False) + Sigmoid
        z = jnp.dot(h, w2t_ref[...], preferred_element_type=jnp.float32)
        o_ref[...] = jax.nn.sigmoid(z).astype(o_ref.dtype)


def _choose_tiles(B, C, L, itemsize, per_buffer_budget):
    # L tile: full L if modest, else a multiple of 128 (BlockSpec rule); the
    # tail block is masked in-kernel.
    tile_l = L if L <= 1024 else 1024
    # Batch tile: keep one x buffer under the budget so double-buffering fits
    # even v7x's 64 MiB VMEM. (TB must be a multiple of 8 or equal to B.)
    rows = max(1, per_buffer_budget // (C * tile_l * itemsize))
    if rows >= B or B < 8:
        tile_b = B
    else:
        tile_b = min(B, max(8, (rows // 8) * 8))
    return tile_b, tile_l


def se_layer(x, w1, w2, *, per_buffer_budget_bytes=8 * 1024 * 1024):
    """x: (B, C, L); w1: (C//r, C); w2: (C, C//r)  -> gate (B, C, 1)."""
    B, C, L = x.shape
    H = w1.shape[0]
    assert w1.shape == (H, C) and w2.shape == (C, H)

    # Pre-transpose weights so both dots are row-major (lane-dense) MXU matmuls.
    w1t = jnp.transpose(w1)      # (C, H)
    w2t = jnp.transpose(w2)      # (H, C)

    x_it = jnp.dtype(x.dtype).itemsize
    w_it = jnp.dtype(w1.dtype).itemsize
    tb, tile_l = _choose_tiles(B, C, L, x_it, per_buffer_budget_bytes)
    fold_w = 128 if tile_l % 128 == 0 else tile_l
    grid = (pl.cdiv(B, tb), pl.cdiv(L, tile_l))

    # VMEM budget: double-buffered x tiles + resident weights + out + scratch,
    # with ~1.5x headroom, clamped to [16 MiB, 64 MiB] (v7x physical).
    need = (2 * tb * C * tile_l * x_it
            + 2 * 2 * C * H * w_it
            + 2 * tb * C * x_it
            + tb * C * fold_w * 4)
    vmem_limit = int(min(64 << 20, max(need * 3 // 2 + (4 << 20), 16 << 20)))

    kernel = functools.partial(_se_kernel, seq_len=L, tile_l=tile_l,
                               fold_w=fold_w)

    out = pl.pallas_call(
        kernel,
        out_shape=jax.ShapeDtypeStruct((B, C), x.dtype),
        grid_spec=pltpu.PrefetchScalarGridSpec(
            num_scalar_prefetch=0,
            grid=grid,
            in_specs=[
                pl.BlockSpec((tb, C, tile_l), lambda b, l: (b, 0, l)),
                pl.BlockSpec((C, H), lambda b, l: (0, 0)),   # resident weight
                pl.BlockSpec((H, C), lambda b, l: (0, 0)),   # resident weight
            ],
            out_specs=pl.BlockSpec((tb, C), lambda b, l: (b, 0)),
            scratch_shapes=[pltpu.VMEM((tb, C, fold_w), jnp.float32)],
        ),
        compiler_params=pltpu.CompilerParams(
            dimension_semantics=("parallel", "arbitrary"),
            vmem_limit_bytes=vmem_limit,
        ),
    )(x, w1t, w2t)

    return out.reshape(B, C, 1)


def se_layer_ref(x, w1, w2):
    y = jnp.mean(x.astype(jnp.float32), axis=-1)
    h = jnp.maximum(y @ w1.T.astype(jnp.float32), 0.0)
    z = jax.nn.sigmoid(h @ w2.T.astype(jnp.float32))
    return z[..., None].astype(x.dtype)


if __name__ == "__main__":
    key = jax.random.PRNGKey(0)

    # Case 1: small shapes consistent with the module (reduction=16 -> H=2).
    B, C, L, reduction = 2, 32, 16, 16
    H = C // reduction
    kx, k1, k2, key = jax.random.split(key, 4)
    x = jax.random.normal(kx, (B, C, L), dtype=jnp.float32)
    w1 = jax.random.normal(k1, (H, C), dtype=jnp.float32) * 0.1   # (C//r, C)
    w2 = jax.random.normal(k2, (C, H), dtype=jnp.float32) * 0.1   # (C, C//r)

    out = jax.block_until_ready(se_layer(x, w1, w2))
    ref = jax.block_until_ready(se_layer_ref(x, w1, w2))
    assert out.shape == (B, C, 1), out.shape
    assert jnp.allclose(out, ref, atol=1e-5, rtol=1e-5), "mismatch vs JAX reference (small)"

    # Case 2: exercises the streaming L grid + masked tail block.
    B2, C2, L2 = 4, 64, 2085
    H2 = C2 // reduction
    kx2, k12, k22, key = jax.random.split(key, 4)
    x2 = jax.random.normal(kx2, (B2, C2, L2), dtype=jnp.float32)
    w12 = jax.random.normal(k12, (H2, C2), dtype=jnp.float32) * 0.1
    w22 = jax.random.normal(k22, (C2, H2), dtype=jnp.float32) * 0.1

    out2 = jax.block_until_ready(se_layer(x2, w12, w22))
    ref2 = jax.block_until_ready(se_layer_ref(x2, w12, w22))
    assert out2.shape == (B2, C2, 1), out2.shape
    assert jnp.allclose(out2, ref2, atol=1e-5, rtol=1e-5), "mismatch vs JAX reference (tiled)"

    print("KERNEL_OK")
</pallas_src>

<mosaic_0001>
module attributes {stable_mosaic.version = 11 : i64} {
  func.func @_se_kernel(%arg0: i32, %arg1: i32, %arg2: memref<2x32x16xf32, #tpu.memory_space<vmem>>, %arg3: memref<32x2xf32, #tpu.memory_space<vmem>>, %arg4: memref<2x32xf32, #tpu.memory_space<vmem>>, %arg5: memref<2x32xf32, #tpu.memory_space<vmem>>, %arg6: memref<2x32x16xf32, #tpu.memory_space<vmem>>) attributes {dimension_semantics = [#tpu.dimension_semantics<parallel>, #tpu.dimension_semantics<arbitrary>], iteration_bounds = array<i64: 1, 1>, scalar_prefetch = 0 : i64, scratch_operands = 1 : i64, tpu.core_type = #tpu.core_type<tc>, window_params = [{transform_indices = @transform_0, window_bounds = array<i64: 2, 32, 16>}, {pipeline_mode = #tpu.pipeline_mode<synchronous>, transform_indices = @transform_1, window_bounds = array<i64: 32, 2>}, {pipeline_mode = #tpu.pipeline_mode<synchronous>, transform_indices = @transform_2, window_bounds = array<i64: 2, 32>}, {transform_indices = @transform_3, window_bounds = array<i64: 2, 32>}]} {
    %c0_i32 = arith.constant 0 : i32
    %0 = arith.cmpi eq, %arg1, %c0_i32 : i32
    %1 = arith.extui %0 : i1 to i32
    %c0_i32_0 = arith.constant 0 : i32
    %2 = arith.cmpi ne, %1, %c0_i32_0 : i32
    scf.if %2 {
      %cst = arith.constant 0.000000e+00 : f32
      %10 = vector.broadcast %cst : f32 to vector<2x32x16xf32>
      %c0_11 = arith.constant 0 : index
      %c0_12 = arith.constant 0 : index
      %c0_13 = arith.constant 0 : index
      %11 = vector.load %arg6[%c0_11, %c0_12, %c0_13] : memref<2x32x16xf32, #tpu.memory_space<vmem>>, vector<2x32x16xf32>
      tpu.vector_store %arg6[%c0_11, %c0_12, %c0_13], %10 {strides = array<i32>} : memref<2x32x16xf32, #tpu.memory_space<vmem>>, vector<2x32x16xf32>,
    } else {
    }
    %c0 = arith.constant 0 : index
    %c0_1 = arith.constant 0 : index
    %c0_2 = arith.constant 0 : index
    %3 = vector.load %arg2[%c0, %c0_1, %c0_2] : memref<2x32x16xf32, #tpu.memory_space<vmem>>, vector<2x32x16xf32>
    %c0_3 = arith.constant 0 : index
    %c0_4 = arith.constant 0 : index
    %c0_5 = arith.constant 0 : index
    %4 = vector.load %arg6[%c0_3, %c0_4, %c0_5] : memref<2x32x16xf32, #tpu.memory_space<vmem>>, vector<2x32x16xf32>
    %5 = arith.addf %4, %3 : vector<2x32x16xf32>
    %c0_6 = arith.constant 0 : index
    %c0_7 = arith.constant 0 : index
    %c0_8 = arith.constant 0 : index
    %6 = vector.load %arg6[%c0_6, %c0_7, %c0_8] : memref<2x32x16xf32, #tpu.memory_space<vmem>>, vector<2x32x16xf32>
    tpu.vector_store %arg6[%c0_6, %c0_7, %c0_8], %5 {strides = array<i32>} : memref<2x32x16xf32, #tpu.memory_space<vmem>>, vector<2x32x16xf32>,
    %c0_i32_9 = arith.constant 0 : i32
    %7 = arith.cmpi eq, %arg1, %c0_i32_9 : i32
    %8 = arith.extui %7 : i1 to i32
    %c0_i32_10 = arith.constant 0 : i32
    %9 = arith.cmpi ne, %8, %c0_i32_10 : i32
    scf.if %9 {
      %c0_11 = arith.constant 0 : index
      %c0_12 = arith.constant 0 : index
      %c0_13 = arith.constant 0 : index
      %10 = vector.load %arg6[%c0_11, %c0_12, %c0_13] : memref<2x32x16xf32, #tpu.memory_space<vmem>>, vector<2x32x16xf32>
      %cst = arith.constant dense<0.000000e+00> : vector<2x32xf32>
      %11 = vector.multi_reduction <add>, %10, %cst [2] : vector<2x32x16xf32> to vector<2x32xf32>
      %cst_14 = arith.constant 6.250000e-02 : f32
      %12 = vector.broadcast %cst_14 : f32 to vector<2x32xf32>
      %13 = arith.mulf %11, %12 : vector<2x32xf32>
      %c0_15 = arith.constant 0 : index
      %c0_16 = arith.constant 0 : index
      %14 = vector.load %arg3[%c0_15, %c0_16] : memref<32x2xf32, #tpu.memory_space<vmem>>, vector<32x2xf32>
      %cst_17 = arith.constant dense<0.000000e+00> : vector<2x2xf32>
      %15 = tpu.matmul %13, %14, %cst_17 {dimension_numbers = #tpu.dot_dimension_numbers<[1], [0], [0], [1], [0, 0, 1, 1], [], []>} : vector<2x32xf32>, vector<32x2xf32>, vector<2x2xf32> -> vector<2x2xf32>
      %cst_18 = arith.constant 0.000000e+00 : f32
      %16 = vector.broadcast %cst_18 : f32 to vector<2x2xf32>
      %17 = arith.maximumf %15, %16 : vector<2x2xf32>
      %c0_19 = arith.constant 0 : index
      %c0_20 = arith.constant 0 : index
      %18 = vector.load %arg4[%c0_19, %c0_20] : memref<2x32xf32, #tpu.memory_space<vmem>>, vector<2x32xf32>
      %cst_21 = arith.constant dense<0.000000e+00> : vector<2x32xf32>
      %19 = tpu.matmul %17, %18, %cst_21 {dimension_numbers = #tpu.dot_dimension_numbers<[1], [0], [0], [1], [0, 0, 1, 1], [], []>} : vector<2x2xf32>, vector<2x32xf32>, vector<2x32xf32> -> vector<2x32xf32>
      %20 = arith.negf %19 : vector<2x32xf32>
      %21 = math.exp %20 : vector<2x32xf32>
      %cst_22 = arith.constant 1.000000e+00 : f32
      %22 = vector.broadcast %cst_22 : f32 to vector<2x32xf32>
      %23 = arith.addf %22, %21 : vector<2x32xf32>
      %24 = arith.divf %22, %23 : vector<2x32xf32>
      %c0_23 = arith.constant 0 : index
      %c0_24 = arith.constant 0 : index
      %25 = vector.load %arg5[%c0_23, %c0_24] : memref<2x32xf32, #tpu.memory_space<vmem>>, vector<2x32xf32>
      tpu.vector_store %arg5[%c0_23, %c0_24], %24 {strides = array<i32>} : memref<2x32xf32, #tpu.memory_space<vmem>>, vector<2x32xf32>,
    } else {
    }
    return
  }
  func.func @transform_0(%arg0: i32, %arg1: i32) -> (i32, i32, i32) {
    %c0_i32 = arith.constant 0 : i32
    %c0_i32_0 = arith.constant 0 : i32
    return %arg0, %c0_i32, %arg1 : i32, i32, i32
  }
  func.func @transform_1(%arg0: i32, %arg1: i32) -> (i32, i32) {
    %c0_i32 = arith.constant 0 : i32
    %c0_i32_0 = arith.constant 0 : i32
    %c0_i32_1 = arith.constant 0 : i32
    return %c0_i32, %c0_i32_0 : i32, i32
  }
  func.func @transform_2(%arg0: i32, %arg1: i32) -> (i32, i32) {
    %c0_i32 = arith.constant 0 : i32
    %c0_i32_0 = arith.constant 0 : i32
    %c0_i32_1 = arith.constant 0 : i32
    return %c0_i32, %c0_i32_0 : i32, i32
  }
  func.func @transform_3(%arg0: i32, %arg1: i32) -> (i32, i32) {
    %c0_i32 = arith.constant 0 : i32
    %c0_i32_0 = arith.constant 0 : i32
    return %arg0, %c0_i32 : i32, i32
  }
}

</mosaic_0001>

<bundles_post_ra>
// kernel: tpu_custom_call.1
= control target key start
LH: loop header
LB: loop body
LE: loop exit
PB: predicated region body
PF: predicated region fallthrough
CT: control target
= control target key end

     0   :  { %vm19_vm0 = vcmask 130048   ;;  %v404_v0 = vmov 0.0   ;;  %s516_s0 = inlined_call_operand.vmem [shape: f32[2,32,16], index: 0, kind: input, shape index: {}]   ;;  %s517_s1 = inlined_call_operand.vmem [shape: f32[32,2], index: 1, kind: input, shape index: {}]   ;;  %s518_s2 = inlined_call_operand.vmem [shape: f32[2,32], index: 2, kind: input, shape index: {}]   ;;  %s519_s3 = inlined_call_operand.hbm [shape: f32[2,32], index: 3, kind: output, shape index: {}]  }
   0x1   :  { %24 = vst.msk [vmem:[#allocation2 + $0x20] sm:$0xff] %vm19_vm0, %v404_v0  ;;  %20 = vst.msk [vmem:[#allocation2] sm:$0xff] %vm19_vm0, %v404_v0  ;;  %361 = vmatprep.subr.mxu1 %v404_v0 }
   0x2   :  { %21 = vst.msk [vmem:[#allocation2 + $0x8] sm:$0xff] %vm19_vm0, %v404_v0  ;;  %22 = vst.msk [vmem:[#allocation2 + $0x10] sm:$0xff] %vm19_vm0, %v404_v0 }
   0x3   :  { %23 = vst.msk [vmem:[#allocation2 + $0x18] sm:$0xff] %vm19_vm0, %v404_v0  ;;  %25 = vst.msk [vmem:[#allocation2 + $0x28] sm:$0xff] %vm19_vm0, %v404_v0 }
   0x4   :  { %26 = vst.msk [vmem:[#allocation2 + $0x30] sm:$0xff] %vm19_vm0, %v404_v0  ;;  %27 = vst.msk [vmem:[#allocation2 + $0x38] sm:$0xff] %vm19_vm0, %v404_v0 }
   0x5   :  { %8 = vsyncpa [#allocation4], 0  ;;  %v32_v1 = vld [vmem:[%s516_s0 + $0x20] sm:$0xff]  ;;  %v33_v3 = vld [vmem:[%s516_s0 + $0x28] sm:$0xff]  ;;  %v405_v44 = vmov 0.0|0.0   ;;  %vm406_vm1 = vmmov 0   ;;  %v116_v48 = vlaneseq }
   0x6   :  { %v28_v2 = vld [vmem:[%s516_s0] sm:$0xff]  ;;  %v29_v4 = vld [vmem:[%s516_s0 + $0x8] sm:$0xff]  ;;  %v34_v5 = vld [vmem:[%s516_s0 + $0x30] sm:$0xff]  ;;  %366 = vmatprep.subr.bf16.mxu0 %v405_v44  ;;  %358 = vmatprep.mubr.msk.f32.mxu0 %vm406_vm1, %v404_v0  ;;  %vm127_vm2 = vcmask 130112   ;;  %vm134_vm3 = vcmask 195712   ;;  %vm141_vm4 = vcmask 261312  }
   0x7   :  { %v30_v6 = vld [vmem:[%s516_s0 + $0x10] sm:$0xff]  ;;  %v35_v7 = vld [vmem:[%s516_s0 + $0x38] sm:$0xff]  ;;  %v104_v41 = vld [vmem:[%s517_s1] sm:$0xff]  ;;  %363 = vmatprep.mubr.msk.f32.mxu1 %vm406_vm1, %v404_v0  ;;  %v117_v51 = vand.u32 127, %v116_v48  ;;  %v119_v53 = vshrl.u32 %v116_v48, 7  ;;  %vm162_vm5 = vcmask 1041409  }
   0x8   :  { %v31_v8 = vld [vmem:[%s516_s0 + $0x18] sm:$0xff]  ;;  %v40_v9 = vld [vmem:[#allocation2 + $0x20] sm:$0xff]  ;;  %v105_v42 = vld [vmem:[%s517_s1 + $0x8] sm:$0xff]  ;;  %vm164_vm6 = vcmask 261120   ;;  %vm243_vm7 = vcmask 1041408   ;;  %vm239_vm8 = vcmask 15360  }
   0x9   :  { %v36_v10 = vld [vmem:[#allocation2] sm:$0xff]  ;;  %v48_v12 = vadd.f32 %v40_v9, %v32_v1  ;;  %v37_v15 = vld [vmem:[#allocation2 + $0x8] sm:$0xff]  ;;  %v38_v17 = vld [vmem:[#allocation2 + $0x10] sm:$0xff]  ;;  %v367_v43 = vpack.c.bf16 %v105_v42, %v104_v41  ;;  %v122_v52 = vadd.s32 4294967288, %v117_v51  ;;  %v129_v56 = vadd.s32 4294967280, %v117_v51  ;;  %s407_s9 = smov [#allocation3]  }
   0xa   :  { %v41_v11 = vld [vmem:[#allocation2 + $0x28] sm:$0xff]  ;;  %v44_v13 = vadd.f32 %v36_v10, %v28_v2  ;;  %v45_v18 = vadd.f32 %v37_v15, %v29_v4  ;;  %v46_v20 = vadd.f32 %v38_v17, %v30_v6  ;;  %v39_v22 = vld [vmem:[#allocation2 + $0x18] sm:$0xff]  ;;  %v106_v45 = vld [vmem:[%s517_s1 + $0x10] sm:$0xff]  ;;  %v136_v60 = vadd.s32 4294967272, %v117_v51  ;;  %s331_s10 = sshll.u32 %s407_s9, 4  ;;  %s332_s10 = int_to_ptr.vmem [resolvable:$true] %s331_s10 }
   0xb   :  { %v49_v14 = vadd.f32 %v41_v11, %v33_v3  ;;  %v42_v16 = vld [vmem:[#allocation2 + $0x30] sm:$0xff]  ;;  %v43_v21 = vld [vmem:[#allocation2 + $0x38] sm:$0xff]  ;;  %57 = vst.msk [vmem:[#allocation2 + $0x20] sm:$0xff] %vm19_vm0, %v48_v12  ;;  %v47_v24 = vadd.f32 %v39_v22, %v31_v8  ;;  %368 = vmatpush3.bf16.msra.mxu0 %v367_v43  ;;  %v125_v57 = vsub.s32 %v122_v52, %v119_v53  ;;  %vm323_vm9 = vcmask 254976   ;;  %p385_p1 = scmp.lt.s32.totalorder %s332_s10, %s332_s10 }
   0xc   :  { %v50_v19 = vadd.f32 %v42_v16, %v34_v5  ;;  %53 = vst.msk [vmem:[#allocation2] sm:$0xff] %vm19_vm0, %v44_v13  ;;  %v51_v23 = vadd.f32 %v43_v21, %v35_v7  ;;  %54 = vst.msk [vmem:[#allocation2 + $0x8] sm:$0xff] %vm19_vm0, %v45_v18  ;;  %369 = vmatprep.subr.bf16.mxu0 %v405_v44  ;;  %v107_v46 = vld [vmem:[%s517_s1 + $0x18] sm:$0xff]  ;;  %v120_v61 = vsub.s32 %v117_v51, %v119_v53 }
   0xd   :  { %58 = vst.msk [vmem:[#allocation2 + $0x28] sm:$0xff] %vm19_vm0, %v49_v14  ;;  %55 = vst.msk [vmem:[#allocation2 + $0x10] sm:$0xff] %vm19_vm0, %v46_v20  ;;  %v370_v47 = vpack.c.bf16 %v107_v46, %v106_v45  ;;  %v132_v62 = vsub.s32 %v129_v56, %v119_v53  ;;  %v139_v7 = vsub.s32 %v136_v60, %v119_v53 }
   0xe   :  { %59 = vst.msk [vmem:[#allocation2 + $0x30] sm:$0xff] %vm19_vm0, %v50_v19  ;;  %60 = vst.msk [vmem:[#allocation2 + $0x38] sm:$0xff] %vm19_vm0, %v51_v23 }
   0xf   :  { %56 = vst.msk [vmem:[#allocation2 + $0x18] sm:$0xff] %vm19_vm0, %v47_v24  ;;  %371 = vmatpush3.bf16.msra.mxu0 %v370_v47 }
  0x12   :  { %v68_v25 = vld [vmem:[#allocation2 + $0x20] sm:$0xff] }
  0x13   :  { %v64_v26 = vld [vmem:[#allocation2] sm:$0xff]  ;;  %v84_v28 = vsel %vm19_vm0, %v68_v25, 0.0  ;;  %v65_v30 = vld [vmem:[#allocation2 + $0x8] sm:$0xff] }
  0x14   :  { %v69_v27 = vld [vmem:[#allocation2 + $0x28] sm:$0xff]  ;;  %v72_v29 = vsel %vm19_vm0, %v64_v26, 0.0  ;;  %85 = vadd.xlane.f32.xlu1 %v84_v28  ;;  %v75_v32 = vsel %vm19_vm0, %v65_v30, 0.0  ;;  %v66_v34 = vld [vmem:[#allocation2 + $0x10] sm:$0xff]  ;;  %v238_v25 = vld [vmem:[%s518_s2] sm:$0x3] }
  0x15   :  { %73 = vadd.xlane.f32.xlu0 %v72_v29  ;;  %v87_v31 = vsel %vm19_vm0, %v69_v27, 0.0  ;;  %v70_v33 = vld [vmem:[#allocation2 + $0x30] sm:$0xff]  ;;  %v78_v36 = vsel %vm19_vm0, %v66_v34, 0.0  ;;  %v71_v37 = vld [vmem:[#allocation2 + $0x38] sm:$0xff]  ;;  %362 = vmatpush3.msk.msra.mxu1 %vm243_vm7, %v238_v25  ;;  %s380_s2 = scalar_lea.vmem %s332_s10, 32 }
  0x16   :  { %v90_v35 = vsel %vm19_vm0, %v70_v33, 0.0  ;;  %v67_v38 = vld [vmem:[#allocation2 + $0x18] sm:$0xff]  ;;  %v93_v39 = vsel %vm19_vm0, %v71_v37, 0.0  ;;  %p381_p0 = scmp.ne.s32.totalorder %s332_s10, %s380_s2  ;;  %p386_p2 = scmp.lt.s32.totalorder %s380_s2, %s380_s2 }
  0x17   :  { %v81_v40 = vsel %vm19_vm0, %v67_v38, 0.0 }
  0x18   :  { %88 = vadd.xlane.f32.xlu1 %v87_v31  ;;  %p387_p3 = por %p386_p2, %p385_p1 }
  0x19   :  { %76 = vadd.xlane.f32.xlu0 %v75_v32 }
  0x1a   :  { %p388_p4 = pnand %p387_p3, %p381_p0 }
  0x1c   :  { %91 = vadd.xlane.f32.xlu1 %v90_v35 }
  0x1d   :  { %79 = vadd.xlane.f32.xlu0 %v78_v36 }
  0x20   :  { %94 = vadd.xlane.f32.xlu1 %v93_v39 }
  0x21   :  { %82 = vadd.xlane.f32.xlu0 %v81_v40 }
  0xa1   :  { %v86_v49 = vpop.xlane.xlu1 %85 }
  0xa2   :  { %v74_v50 = vpop.xlane.xlu0 %73  ;;  %v100_v2 = vmul.f32 0.0625, %v86_v49 }
  0xa3   :  { %v96_v3 = vmul.f32 0.0625, %v74_v50 }
  0xa4   :  { %v146_v12 = vrot.slane %v100_v2, %v120_v61 }
  0xa5   :  { %v89_v54 = vpop.xlane.xlu1 %88  ;;  %v121_v13 = vrot.slane %v96_v3, %v120_v61 }
  0xa6   :  { %v77_v55 = vpop.xlane.xlu0 %76  ;;  %v101_v58 = vmul.f32 0.0625, %v89_v54 }
  0xa7   :  { %v97_v59 = vmul.f32 0.0625, %v77_v55 }
  0xa8   :  { %v150_v5 = vrot.slane %v101_v58, %v125_v57 }
  0xa9   :  { %v92_v63 = vpop.xlane.xlu1 %91  ;;  %v126_v6 = vrot.slane %v97_v59, %v125_v57 }
  0xaa   :  { %v80_v1 = vpop.xlane.xlu0 %79  ;;  %v102_v0 = vmul.f32 0.0625, %v92_v63  ;;  %v151_v16 = vsel %vm127_vm2, %v150_v5, %v146_v12 }
  0xab   :  { %v98_v4 = vmul.f32 0.0625, %v80_v1  ;;  %v128_v17 = vsel %vm127_vm2, %v126_v6, %v121_v13 }
  0xac   :  { %v155_v8 = vrot.slane %v102_v0, %v132_v62 }
  0xad   :  { %v133_v9 = vrot.slane %v98_v4, %v132_v62  ;;  %v95_v10 = vpop.xlane.xlu1 %94 }
  0xae   :  { %v83_v11 = vpop.xlane.xlu0 %82  ;;  %v103_v14 = vmul.f32 0.0625, %v95_v10  ;;  %v156_v20 = vsel %vm134_vm3, %v155_v8, %v151_v16 }
  0xaf   :  { %v99_v15 = vmul.f32 0.0625, %v83_v11  ;;  %v135_v21 = vsel %vm134_vm3, %v133_v9, %v128_v17 }
  0xb0   :  { %v160_v18 = vrot.slane %v103_v14, %v139_v7 }
  0xb1   :  { %v140_v19 = vrot.slane %v99_v15, %v139_v7 }
  0xb2   :  { %v161_v23 = vsel %vm141_vm4, %v160_v18, %v156_v20 }
  0xb3   :  { %v142_v22 = vsel %vm141_vm4, %v140_v19, %v135_v21 }
  0xb4   :  { %v163_v24 = vsel %vm162_vm5, %v161_v23, %v142_v22 }
  0xb5   :  { %359 = vmatmul.mubr.msk.f32.vlgmr.msra.gmra.mrb[0].mxu0 %vm164_vm6, %v163_v24 }
 0x188   :  { %v233_v26 = vpop.f32.mrb[0].mxu0 }
 0x189   :  { %v237_v27 = vmax.f32 %v233_v26, 0.0  ;;  %v360_v28 = vpop.f32.mrb[1].mxu0 }
 0x18b   :  { %364 = vmatmul.mubr.msk.f32.vlgmr.msra.gmra.mrb[0].mxu1 %vm239_vm8, %v237_v27 }
 0x25e   :  { %v313_v29 = vpop.f32.mrb[0].mxu1 }
 0x25f   :  { %v342_v30 = vmul.f32 -1.442695, %v313_v29  ;;  %v365_v31 = vpop.f32.mrb[1].mxu1 }
 0x261   :  { %376 = vpow2.f32 %v342_v30 }
 0x26b   :  { %v377_v32 = vpop.eup %376 }
 0x26c   :  { %v320_v33 = vadd.f32 1.0, %v377_v32 }
 0x26e   :  { %378 = vrcp.f32 %v320_v33 }
 0x278   :  { %v379_v34 = vpop.eup %378 }
 0x279   :  { %324 = vst.msk [vmem:[#allocation3] sm:$0x3] %vm323_vm9, %v379_v34 }
 0x27a   :  { %391 = shalt.err (!%p388_p4)
}
 0x27b   :  { %s392_s13 = scalar_lea.hbm %s519_s3, 32 }
 0x27c   :  { %p393_p5 = scmp.ne.s32.totalorder %s519_s3, %s392_s13  ;;  %p396_p6 = scmp.lt.u32.totalorder %s392_s13, %s519_s3 }
 0x27e   :  { %p398_p7 = pnand %p396_p6, %p393_p5 }
 0x280   :  { %401 = shalt.err (!%p398_p7)
}
 0x281   :  { %334 = dma.vmem_to_hbm [thread:$0]  %s332_s10, 32, %s519_s3, [#allocation4]  }
 0x282   :  { %402 = dma.done.wait [#allocation4], 32  }
 0x283   :  { %403 = vsyncadd [#allocation4], 4294967264 }
 0x284   :  { %338 = vsyncpa [#allocation4], 1 }

</bundles_post_ra>
